<compile_context>
chip_gen: v7x
topology: tpu7x:2x2x1
jax: 0.10.0
libtpu: 0.0.40
codegen_flags: <defaults>
</compile_context>

<pallas_src>
from functools import lru_cache

import numpy as np
import jax
import jax.numpy as jnp
from jax.experimental import pallas as pl
from jax.experimental.pallas import tpu as pltpu


@lru_cache(maxsize=16)
def _centered_idft_mats(H, W):
    """Shifted inverse-DFT matrices (bf16 real/imag planes) for the centered ifft2."""
    def centered_idft(n):
        eye = np.eye(n, dtype=np.complex64)
        return np.fft.ifftshift(
            np.fft.ifft(np.fft.ifftshift(eye, axes=0), axis=0), axes=0)

    a_h = centered_idft(H)          # left-multiply matrix (acts on the H axis)
    b_w = centered_idft(W).T        # right-multiply matrix (acts on the W axis)
    ahr = jnp.asarray(np.real(a_h), dtype=jnp.bfloat16)
    ahi = jnp.asarray(np.imag(a_h), dtype=jnp.bfloat16)
    bwr = jnp.asarray(np.real(b_w), dtype=jnp.bfloat16)
    bwi = jnp.asarray(np.imag(b_w), dtype=jnp.bfloat16)
    return ahr, ahi, bwr, bwi


def _pick_row_tile(H):
    """Output row tile: <=256 (MXU M dim), multiple of 16 (bf16 sublanes), divides H."""
    if H <= 256:
        return H
    for cand in (256, 128, 64, 32, 16):
        if H % cand == 0:
            return cand
    return H


def _vmem_limit_bytes():
    """Chip-aware VMEM limit with 25% headroom for compiler scratch / double buffers."""
    try:
        cap = int(pltpu.get_tpu_info().vmem_capacity_bytes)
    except Exception:
        cap = 64 * 1024 * 1024
    return cap * 3 // 4


def aty_kernel(ksr_ref, ksi_ref, csr_ref, csi_ref,
               ahr_ref, ahi_ref, bwr_ref, bwi_ref,
               or_ref, oi_ref):
    """One (batch, row-tile, coil) grid step: pre-masked k-space coil plane -> centered
    iDFT (two complex MXU matmuls) -> conj(csm) combine, accumulated into the resident
    f32 output block."""
    c = pl.program_id(2)

    @pl.when(c == 0)
    def _init():
        or_ref[...] = jnp.zeros_like(or_ref)
        oi_ref[...] = jnp.zeros_like(oi_ref)

    ksr = ksr_ref[0, 0]           # (H, W) bf16, mask already applied in the wrapper
    ksi = ksi_ref[0, 0]
    ahr = ahr_ref[...]            # (th, H) bf16
    ahi = ahi_ref[...]
    bwr = bwr_ref[...]            # (W, W) bf16
    bwi = bwi_ref[...]

    # Stage A: rows of A_H applied to the H axis -> (th, W), f32 accumulation on the MXU.
    t_r = (jnp.dot(ahr, ksr, preferred_element_type=jnp.float32)
           - jnp.dot(ahi, ksi, preferred_element_type=jnp.float32))
    t_i = (jnp.dot(ahr, ksi, preferred_element_type=jnp.float32)
           + jnp.dot(ahi, ksr, preferred_element_type=jnp.float32))

    # Stage B: A_W^T applied to the W axis; LHS downcast to bf16 for the MXU.
    tr_b = t_r.astype(jnp.bfloat16)
    ti_b = t_i.astype(jnp.bfloat16)
    cir = (jnp.dot(tr_b, bwr, preferred_element_type=jnp.float32)
           - jnp.dot(ti_b, bwi, preferred_element_type=jnp.float32))
    cii = (jnp.dot(tr_b, bwi, preferred_element_type=jnp.float32)
           + jnp.dot(ti_b, bwr, preferred_element_type=jnp.float32))

    # CI * conj(csm): (a+ib)(c-id) = (ac+bd) + i(bc-ad); f32 on the VPU, accumulated into
    # the resident output block (flushed to HBM only when the (b, t) block changes).
    csr = csr_ref[0, 0].astype(jnp.float32)
    csi = csi_ref[0, 0].astype(jnp.float32)
    or_ref[0] = or_ref[0] + (cir * csr + cii * csi)
    oi_ref[0] = oi_ref[0] + (cii * csr - cir * csi)


def aty_forward(kdata, csm, mask, *, row_tile=None):
    B, C, H, W = kdata.shape
    th = row_tile if row_tile is not None else _pick_row_tile(H)
    assert H % th == 0
    T = H // th

    ahr, ahi, bwr, bwi = _centered_idft_mats(H, W)

    # Mask applied once, in f32, in the wrapper; MXU operands streamed as bf16.
    ks = kdata * mask[:, None, :, :]
    ksr = jnp.real(ks).astype(jnp.bfloat16)
    ksi = jnp.imag(ks).astype(jnp.bfloat16)
    # csm streamed as bf16 (halves the dominant HBM stream), upcast inside the kernel.
    csr = jnp.real(csm).astype(jnp.bfloat16)
    csi = jnp.imag(csm).astype(jnp.bfloat16)

    # One (H, W) coil plane per grid step (streamed over the innermost coil axis);
    # re-fetched per row tile, but T == 1 for typical H <= 256.
    kspec = pl.BlockSpec((1, 1, H, W), lambda b, t, c: (b, c, 0, 0))
    cspec = pl.BlockSpec((1, 1, th, W), lambda b, t, c: (b, c, t, 0))
    ah_spec = pl.BlockSpec((th, H), lambda b, t, c: (t, 0))
    bw_spec = pl.BlockSpec((W, W), lambda b, t, c: (0, 0))
    ospec = pl.BlockSpec((1, th, W), lambda b, t, c: (b, t, 0))

    out_r, out_i = pl.pallas_call(
        aty_kernel,
        out_shape=(jax.ShapeDtypeStruct((B, H, W), jnp.float32),
                   jax.ShapeDtypeStruct((B, H, W), jnp.float32)),
        grid_spec=pltpu.PrefetchScalarGridSpec(
            num_scalar_prefetch=0,
            grid=(B, T, C),
            in_specs=[kspec, kspec, cspec, cspec,
                      ah_spec, ah_spec, bw_spec, bw_spec],
            out_specs=[ospec, ospec],
        ),
        compiler_params=pltpu.CompilerParams(
            dimension_semantics=("parallel", "parallel", "arbitrary"),
            vmem_limit_bytes=_vmem_limit_bytes()),
    )(ksr, ksi, csr, csi, ahr, ahi, bwr, bwi)

    return jax.lax.complex(out_r, out_i)


def aty_reference(kdata, csm, mask):
    ks = kdata * mask[:, None, :, :]
    ci = jnp.fft.ifftshift(
        jnp.fft.ifft2(jnp.fft.ifftshift(ks, axes=(-2, -1)), axes=(-2, -1)),
        axes=(-2, -1))
    return jnp.sum(ci * jnp.conj(csm), axis=1)


if __name__ == "__main__":
    B, C, H, W = 2, 4, 16, 16
    key = jax.random.PRNGKey(0)
    k1, k2, k3, k4, k5 = jax.random.split(key, 5)

    kdata = (jax.random.normal(k1, (B, C, H, W), jnp.float32)
             + 1j * jax.random.normal(k2, (B, C, H, W), jnp.float32)).astype(jnp.complex64)
    csm = (jax.random.normal(k3, (B, C, H, W), jnp.float32)
           + 1j * jax.random.normal(k4, (B, C, H, W), jnp.float32)).astype(jnp.complex64)
    mask = (jax.random.uniform(k5, (B, H, W)) > 0.5).astype(jnp.float32)

    rec = jax.block_until_ready(aty_forward(kdata, csm, mask))
    ref = aty_reference(kdata, csm, mask)

    np.testing.assert_allclose(np.asarray(rec), np.asarray(ref), rtol=1e-2, atol=1e-2)
    print("KERNEL_OK")
</pallas_src>

<mosaic_0001>
module attributes {stable_mosaic.version = 11 : i64} {
  func.func @aty_kernel(%arg0: i32, %arg1: i32, %arg2: i32, %arg3: memref<1x1x16x16xbf16, #tpu.memory_space<vmem>>, %arg4: memref<1x1x16x16xbf16, #tpu.memory_space<vmem>>, %arg5: memref<1x1x16x16xbf16, #tpu.memory_space<vmem>>, %arg6: memref<1x1x16x16xbf16, #tpu.memory_space<vmem>>, %arg7: memref<16x16xbf16, #tpu.memory_space<vmem>>, %arg8: memref<16x16xbf16, #tpu.memory_space<vmem>>, %arg9: memref<16x16xbf16, #tpu.memory_space<vmem>>, %arg10: memref<16x16xbf16, #tpu.memory_space<vmem>>, %arg11: memref<1x16x16xf32, #tpu.memory_space<vmem>>, %arg12: memref<1x16x16xf32, #tpu.memory_space<vmem>>) attributes {dimension_semantics = [#tpu.dimension_semantics<parallel>, #tpu.dimension_semantics<parallel>, #tpu.dimension_semantics<arbitrary>], iteration_bounds = array<i64: 2, 1, 4>, scalar_prefetch = 0 : i64, scratch_operands = 0 : i64, tpu.core_type = #tpu.core_type<tc>, window_params = [{transform_indices = @transform_0, window_bounds = array<i64: 1, 1, 16, 16>}, {transform_indices = @transform_1, window_bounds = array<i64: 1, 1, 16, 16>}, {transform_indices = @transform_2, window_bounds = array<i64: 1, 1, 16, 16>}, {transform_indices = @transform_3, window_bounds = array<i64: 1, 1, 16, 16>}, {transform_indices = @transform_4, window_bounds = array<i64: 16, 16>}, {transform_indices = @transform_5, window_bounds = array<i64: 16, 16>}, {pipeline_mode = #tpu.pipeline_mode<synchronous>, transform_indices = @transform_6, window_bounds = array<i64: 16, 16>}, {pipeline_mode = #tpu.pipeline_mode<synchronous>, transform_indices = @transform_7, window_bounds = array<i64: 16, 16>}, {transform_indices = @transform_8, window_bounds = array<i64: 1, 16, 16>}, {transform_indices = @transform_9, window_bounds = array<i64: 1, 16, 16>}]} {
    %c0_i32 = arith.constant 0 : i32
    %0 = arith.cmpi eq, %arg2, %c0_i32 : i32
    %1 = arith.extui %0 : i1 to i32
    %c0_i32_0 = arith.constant 0 : i32
    %2 = arith.cmpi ne, %1, %c0_i32_0 : i32
    scf.if %2 {
      %cst_43 = arith.constant 0.000000e+00 : f32
      %49 = vector.broadcast %cst_43 : f32 to vector<1x16x16xf32>
      %c0_44 = arith.constant 0 : index
      %c0_45 = arith.constant 0 : index
      %c0_46 = arith.constant 0 : index
      %50 = vector.load %arg11[%c0_44, %c0_45, %c0_46] : memref<1x16x16xf32, #tpu.memory_space<vmem>>, vector<1x16x16xf32>
      tpu.vector_store %arg11[%c0_44, %c0_45, %c0_46], %49 {strides = array<i32>} : memref<1x16x16xf32, #tpu.memory_space<vmem>>, vector<1x16x16xf32>,
      %cst_47 = arith.constant 0.000000e+00 : f32
      %51 = vector.broadcast %cst_47 : f32 to vector<1x16x16xf32>
      %c0_48 = arith.constant 0 : index
      %c0_49 = arith.constant 0 : index
      %c0_50 = arith.constant 0 : index
      %52 = vector.load %arg12[%c0_48, %c0_49, %c0_50] : memref<1x16x16xf32, #tpu.memory_space<vmem>>, vector<1x16x16xf32>
      tpu.vector_store %arg12[%c0_48, %c0_49, %c0_50], %51 {strides = array<i32>} : memref<1x16x16xf32, #tpu.memory_space<vmem>>, vector<1x16x16xf32>,
    } else {
    }
    %c0 = arith.constant 0 : index
    %c0_1 = arith.constant 0 : index
    %c0_2 = arith.constant 0 : index
    %c0_3 = arith.constant 0 : index
    %3 = vector.load %arg3[%c0, %c0_1, %c0_2, %c0_3] : memref<1x1x16x16xbf16, #tpu.memory_space<vmem>>, vector<1x1x16x16xbf16>
    %4 = vector.shape_cast %3 : vector<1x1x16x16xbf16> to vector<16x16xbf16>
    %c0_4 = arith.constant 0 : index
    %c0_5 = arith.constant 0 : index
    %c0_6 = arith.constant 0 : index
    %c0_7 = arith.constant 0 : index
    %5 = vector.load %arg4[%c0_4, %c0_5, %c0_6, %c0_7] : memref<1x1x16x16xbf16, #tpu.memory_space<vmem>>, vector<1x1x16x16xbf16>
    %6 = vector.shape_cast %5 : vector<1x1x16x16xbf16> to vector<16x16xbf16>
    %c0_8 = arith.constant 0 : index
    %c0_9 = arith.constant 0 : index
    %7 = vector.load %arg7[%c0_8, %c0_9] : memref<16x16xbf16, #tpu.memory_space<vmem>>, vector<16x16xbf16>
    %c0_10 = arith.constant 0 : index
    %c0_11 = arith.constant 0 : index
    %8 = vector.load %arg8[%c0_10, %c0_11] : memref<16x16xbf16, #tpu.memory_space<vmem>>, vector<16x16xbf16>
    %c0_12 = arith.constant 0 : index
    %c0_13 = arith.constant 0 : index
    %9 = vector.load %arg9[%c0_12, %c0_13] : memref<16x16xbf16, #tpu.memory_space<vmem>>, vector<16x16xbf16>
    %c0_14 = arith.constant 0 : index
    %c0_15 = arith.constant 0 : index
    %10 = vector.load %arg10[%c0_14, %c0_15] : memref<16x16xbf16, #tpu.memory_space<vmem>>, vector<16x16xbf16>
    %cst = arith.constant dense<0.000000e+00> : vector<16x16xf32>
    %11 = tpu.matmul %7, %4, %cst {dimension_numbers = #tpu.dot_dimension_numbers<[1], [0], [0], [1], [0, 0, 1, 1], [], []>} : vector<16x16xbf16>, vector<16x16xbf16>, vector<16x16xf32> -> vector<16x16xf32>
    %cst_16 = arith.constant dense<0.000000e+00> : vector<16x16xf32>
    %12 = tpu.matmul %8, %6, %cst_16 {dimension_numbers = #tpu.dot_dimension_numbers<[1], [0], [0], [1], [0, 0, 1, 1], [], []>} : vector<16x16xbf16>, vector<16x16xbf16>, vector<16x16xf32> -> vector<16x16xf32>
    %13 = arith.subf %11, %12 : vector<16x16xf32>
    %cst_17 = arith.constant dense<0.000000e+00> : vector<16x16xf32>
    %14 = tpu.matmul %7, %6, %cst_17 {dimension_numbers = #tpu.dot_dimension_numbers<[1], [0], [0], [1], [0, 0, 1, 1], [], []>} : vector<16x16xbf16>, vector<16x16xbf16>, vector<16x16xf32> -> vector<16x16xf32>
    %cst_18 = arith.constant dense<0.000000e+00> : vector<16x16xf32>
    %15 = tpu.matmul %8, %4, %cst_18 {dimension_numbers = #tpu.dot_dimension_numbers<[1], [0], [0], [1], [0, 0, 1, 1], [], []>} : vector<16x16xbf16>, vector<16x16xbf16>, vector<16x16xf32> -> vector<16x16xf32>
    %16 = arith.addf %14, %15 : vector<16x16xf32>
    %17 = arith.truncf %13 : vector<16x16xf32> to vector<16x16xbf16>
    %18 = arith.truncf %16 : vector<16x16xf32> to vector<16x16xbf16>
    %cst_19 = arith.constant dense<0.000000e+00> : vector<16x16xf32>
    %19 = tpu.matmul %17, %9, %cst_19 {dimension_numbers = #tpu.dot_dimension_numbers<[1], [0], [0], [1], [0, 0, 1, 1], [], []>} : vector<16x16xbf16>, vector<16x16xbf16>, vector<16x16xf32> -> vector<16x16xf32>
    %cst_20 = arith.constant dense<0.000000e+00> : vector<16x16xf32>
    %20 = tpu.matmul %18, %10, %cst_20 {dimension_numbers = #tpu.dot_dimension_numbers<[1], [0], [0], [1], [0, 0, 1, 1], [], []>} : vector<16x16xbf16>, vector<16x16xbf16>, vector<16x16xf32> -> vector<16x16xf32>
    %21 = arith.subf %19, %20 : vector<16x16xf32>
    %cst_21 = arith.constant dense<0.000000e+00> : vector<16x16xf32>
    %22 = tpu.matmul %17, %10, %cst_21 {dimension_numbers = #tpu.dot_dimension_numbers<[1], [0], [0], [1], [0, 0, 1, 1], [], []>} : vector<16x16xbf16>, vector<16x16xbf16>, vector<16x16xf32> -> vector<16x16xf32>
    %cst_22 = arith.constant dense<0.000000e+00> : vector<16x16xf32>
    %23 = tpu.matmul %18, %9, %cst_22 {dimension_numbers = #tpu.dot_dimension_numbers<[1], [0], [0], [1], [0, 0, 1, 1], [], []>} : vector<16x16xbf16>, vector<16x16xbf16>, vector<16x16xf32> -> vector<16x16xf32>
    %24 = arith.addf %22, %23 : vector<16x16xf32>
    %c0_23 = arith.constant 0 : index
    %c0_24 = arith.constant 0 : index
    %c0_25 = arith.constant 0 : index
    %c0_26 = arith.constant 0 : index
    %25 = vector.load %arg5[%c0_23, %c0_24, %c0_25, %c0_26] : memref<1x1x16x16xbf16, #tpu.memory_space<vmem>>, vector<1x1x16x16xbf16>
    %26 = vector.shape_cast %25 : vector<1x1x16x16xbf16> to vector<16x16xbf16>
    %27 = arith.extf %26 : vector<16x16xbf16> to vector<16x16xf32>
    %c0_27 = arith.constant 0 : index
    %c0_28 = arith.constant 0 : index
    %c0_29 = arith.constant 0 : index
    %c0_30 = arith.constant 0 : index
    %28 = vector.load %arg6[%c0_27, %c0_28, %c0_29, %c0_30] : memref<1x1x16x16xbf16, #tpu.memory_space<vmem>>, vector<1x1x16x16xbf16>
    %29 = vector.shape_cast %28 : vector<1x1x16x16xbf16> to vector<16x16xbf16>
    %30 = arith.extf %29 : vector<16x16xbf16> to vector<16x16xf32>
    %c0_31 = arith.constant 0 : index
    %c0_32 = arith.constant 0 : index
    %c0_33 = arith.constant 0 : index
    %31 = vector.load %arg11[%c0_31, %c0_32, %c0_33] : memref<1x16x16xf32, #tpu.memory_space<vmem>>, vector<1x16x16xf32>
    %32 = vector.shape_cast %31 : vector<1x16x16xf32> to vector<16x16xf32>
    %33 = arith.mulf %21, %27 : vector<16x16xf32>
    %34 = arith.mulf %24, %30 : vector<16x16xf32>
    %35 = arith.addf %33, %34 : vector<16x16xf32>
    %36 = arith.addf %32, %35 : vector<16x16xf32>
    %c0_34 = arith.constant 0 : index
    %c0_35 = arith.constant 0 : index
    %c0_36 = arith.constant 0 : index
    %37 = vector.load %arg11[%c0_34, %c0_35, %c0_36] : memref<1x16x16xf32, #tpu.memory_space<vmem>>, vector<1x16x16xf32>
    %38 = vector.shape_cast %37 : vector<1x16x16xf32> to vector<16x16xf32>
    %39 = vector.shape_cast %36 : vector<16x16xf32> to vector<1x16x16xf32>
    tpu.vector_store %arg11[%c0_34, %c0_35, %c0_36], %39 {strides = array<i32>} : memref<1x16x16xf32, #tpu.memory_space<vmem>>, vector<1x16x16xf32>,
    %c0_37 = arith.constant 0 : index
    %c0_38 = arith.constant 0 : index
    %c0_39 = arith.constant 0 : index
    %40 = vector.load %arg12[%c0_37, %c0_38, %c0_39] : memref<1x16x16xf32, #tpu.memory_space<vmem>>, vector<1x16x16xf32>
    %41 = vector.shape_cast %40 : vector<1x16x16xf32> to vector<16x16xf32>
    %42 = arith.mulf %24, %27 : vector<16x16xf32>
    %43 = arith.mulf %21, %30 : vector<16x16xf32>
    %44 = arith.subf %42, %43 : vector<16x16xf32>
    %45 = arith.addf %41, %44 : vector<16x16xf32>
    %c0_40 = arith.constant 0 : index
    %c0_41 = arith.constant 0 : index
    %c0_42 = arith.constant 0 : index
    %46 = vector.load %arg12[%c0_40, %c0_41, %c0_42] : memref<1x16x16xf32, #tpu.memory_space<vmem>>, vector<1x16x16xf32>
    %47 = vector.shape_cast %46 : vector<1x16x16xf32> to vector<16x16xf32>
    %48 = vector.shape_cast %45 : vector<16x16xf32> to vector<1x16x16xf32>
    tpu.vector_store %arg12[%c0_40, %c0_41, %c0_42], %48 {strides = array<i32>} : memref<1x16x16xf32, #tpu.memory_space<vmem>>, vector<1x16x16xf32>,
    return
  }
  func.func @transform_0(%arg0: i32, %arg1: i32, %arg2: i32) -> (i32, i32, i32, i32) {
    %c0_i32 = arith.constant 0 : i32
    %c0_i32_0 = arith.constant 0 : i32
    %c0_i32_1 = arith.constant 0 : i32
    return %arg0, %arg2, %c0_i32, %c0_i32_0 : i32, i32, i32, i32
  }
  func.func @transform_1(%arg0: i32, %arg1: i32, %arg2: i32) -> (i32, i32, i32, i32) {
    %c0_i32 = arith.constant 0 : i32
    %c0_i32_0 = arith.constant 0 : i32
    %c0_i32_1 = arith.constant 0 : i32
    return %arg0, %arg2, %c0_i32, %c0_i32_0 : i32, i32, i32, i32
  }
  func.func @transform_2(%arg0: i32, %arg1: i32, %arg2: i32) -> (i32, i32, i32, i32) {
    %c0_i32 = arith.constant 0 : i32
    %c0_i32_0 = arith.constant 0 : i32
    return %arg0, %arg2, %arg1, %c0_i32 : i32, i32, i32, i32
  }
  func.func @transform_3(%arg0: i32, %arg1: i32, %arg2: i32) -> (i32, i32, i32, i32) {
    %c0_i32 = arith.constant 0 : i32
    %c0_i32_0 = arith.constant 0 : i32
    return %arg0, %arg2, %arg1, %c0_i32 : i32, i32, i32, i32
  }
  func.func @transform_4(%arg0: i32, %arg1: i32, %arg2: i32) -> (i32, i32) {
    %c0_i32 = arith.constant 0 : i32
    %c0_i32_0 = arith.constant 0 : i32
    return %arg1, %c0_i32 : i32, i32
  }
  func.func @transform_5(%arg0: i32, %arg1: i32, %arg2: i32) -> (i32, i32) {
    %c0_i32 = arith.constant 0 : i32
    %c0_i32_0 = arith.constant 0 : i32
    return %arg1, %c0_i32 : i32, i32
  }
  func.func @transform_6(%arg0: i32, %arg1: i32, %arg2: i32) -> (i32, i32) {
    %c0_i32 = arith.constant 0 : i32
    %c0_i32_0 = arith.constant 0 : i32
    %c0_i32_1 = arith.constant 0 : i32
    return %c0_i32, %c0_i32_0 : i32, i32
  }
  func.func @transform_7(%arg0: i32, %arg1: i32, %arg2: i32) -> (i32, i32) {
    %c0_i32 = arith.constant 0 : i32
    %c0_i32_0 = arith.constant 0 : i32
    %c0_i32_1 = arith.constant 0 : i32
    return %c0_i32, %c0_i32_0 : i32, i32
  }
  func.func @transform_8(%arg0: i32, %arg1: i32, %arg2: i32) -> (i32, i32, i32) {
    %c0_i32 = arith.constant 0 : i32
    %c0_i32_0 = arith.constant 0 : i32
    return %arg0, %arg1, %c0_i32 : i32, i32, i32
  }
  func.func @transform_9(%arg0: i32, %arg1: i32, %arg2: i32) -> (i32, i32, i32) {
    %c0_i32 = arith.constant 0 : i32
    %c0_i32_0 = arith.constant 0 : i32
    return %arg0, %arg1, %c0_i32 : i32, i32, i32
  }
}

</mosaic_0001>

<bundles_post_ra>
// kernel: tpu_custom_call.1
= control target key start
LH: loop header
LB: loop body
LE: loop exit
PB: predicated region body
PF: predicated region fallthrough
CT: control target
= control target key end

     0   :  { %s2472_s0 = inlined_call_operand.hbm [shape: bf16[2,4,16,16], index: 0, kind: input, shape index: {}]   ;;  %s2473_s1 = inlined_call_operand.hbm [shape: bf16[2,4,16,16], index: 1, kind: input, shape index: {}]   ;;  %s2474_s2 = inlined_call_operand.hbm [shape: bf16[2,4,16,16], index: 2, kind: input, shape index: {}]   ;;  %s2475_s3 = inlined_call_operand.hbm [shape: bf16[2,4,16,16], index: 3, kind: input, shape index: {}]   ;;  %s2476_s4 = inlined_call_operand.vmem [shape: bf16[16,16], index: 4, kind: input, shape index: {}]   ;;  %s2477_s5 = inlined_call_operand.vmem [shape: bf16[16,16], index: 5, kind: input, shape index: {}]   ;;  %s2478_s6 = inlined_call_operand.hbm [shape: bf16[16,16], index: 6, kind: input, shape index: {}]   ;;  %s2479_s7 = inlined_call_operand.vmem [shape: bf16[16,16], index: 7, kind: input, shape index: {}]   ;;  %s2480_s8 = inlined_call_operand.hbm [shape: f32[2,16,16], index: 8, kind: output, shape index: {0}]   ;;  %s2481_s9 = inlined_call_operand.hbm [shape: f32[2,16,16], index: 9, kind: output, shape index: {1}]  }
   0x1   :  { %2502 = sst [smem:[#allocation29_spill]] %s2473_s1 }
   0x2   :  { %2503 = sst [smem:[#allocation30_spill]] %s2476_s4 }
   0x3   :  { %2504 = sst [smem:[#allocation31_spill]] %s2477_s5 }
   0x4   :  { %2505 = sst [smem:[#allocation32_spill]] %s2478_s6 }
   0x5   :  { %2506 = sst [smem:[#allocation33_spill]] %s2479_s7 }
   0x6   :  { %2507 = sst [smem:[#allocation34_spill]] %s2480_s8 }
   0x7   :  { %2508 = sst [smem:[#allocation35_spill]] %s2481_s9 }
   0x8   :  { %15 = vsyncpa [#allocation3], 0 }
   0x9   :  { %17 = vsyncpa [#allocation3 + $0x1], 0 }
   0xa   :  { %18 = vsyncpa [#allocation6], 0 }
   0xb   :  { %20 = vsyncpa [#allocation6 + $0x1], 0 }
   0xc   :  { %21 = vsyncpa [#allocation9], 0 }
   0xd   :  { %23 = vsyncpa [#allocation9 + $0x1], 0 }
   0xe   :  { %24 = vsyncpa [#allocation4], 0 }
   0xf   :  { %26 = vsyncpa [#allocation4 + $0x1], 0 }
  0x10   :  { %27 = vsyncpa [#allocation13], 0 }
  0x11   :  { %29 = vsyncpa [#allocation13 + $0x1], 0  ;;  %s1970_s30 = smov 0   ;;  %s1972_s10 = smov 0  }
  0x12   :  { %s1974_s11 = smov 0   ;;  %s1976_s12 = smov 0  }
  0x13   :  { %s1978_s13 = smov 0   ;;  %s1980_s14 = smov 0  }
  0x14   :  { %s1982_s15 = smov 0   ;;  %s1984_s16 = smov 0  }
  0x15   :  { %s1986_s17 = smov 0   ;;  %s1988_s18 = smov 0  }
  0x16   :  { %s1990_s19 = smov 0  }
  0x17 LB: > { %2509 = sst [smem:[#allocation20_spill]] %s1864_s30  ;;  %s2024_s20 = sadd.s32 4294967295, %s1904_s19   ;;  %s1904_s19 = sphi %s1990_s19, %s35_s19   ;;  %s1900_s18 = sphi %s1988_s18, %s2555_s18   ;;  %s1896_s17 = sphi %s1986_s17, %s2554_s17   ;;  %s1892_s16 = sphi %s1984_s16, %s2553_s16   ;;  %s1888_s15 = sphi %s1982_s15, %s2552_s15   ;;  %s1884_s14 = sphi %s1980_s14, %s2561_s14   ;;  %s1880_s13 = sphi %s1978_s13, %s2560_s13   ;;  %s1876_s12 = sphi %s1976_s12, %s2559_s12   ;;  %s1872_s11 = sphi %s1974_s11, %s2558_s11   ;;  %s1868_s10 = sphi %s1972_s10, %s2557_s10   ;;  %s1864_s30 = sphi %s1970_s30, %s2556_s30  }
  0x18   : > { %2510 = sst [smem:[#allocation21_spill]] %s1888_s15  ;;  %s1309_s21 = sadd.s32 4294967294, %s1904_s19  }
  0x19   : > { %2511 = sst [smem:[#allocation22_spill]] %s1892_s16  ;;  %p70_p0 = scmp.ne.s32.totalorder %s1884_s14, %s1880_s13 }
  0x1a   : > { %2512 = sst [smem:[#allocation23_spill]] %s1896_s17  ;;  %p71_p1 = scmp.eq.s32.totalorder %s1904_s19, 0 }
  0x1b   : > { %2513 = sst [smem:[#allocation24_spill]] %s1900_s18  ;;  %p76_p2 = scmp.ne.s32.totalorder %s1880_s13, %s1876_s12 }
  0x1c   : > { %p2488_p3 = scmp.eq.s32.totalorder %s2024_s20, 0  ;;  %p2034_p4 = por %p71_p1, %p70_p0 }
  0x1d   : > { %p283_p5 = scmp.ne.s32.totalorder %s1872_s11, %s1868_s10  ;;  %p284_p7 = scmp.eq.s32.totalorder %s2024_s20, 7 }
  0x1e   : > { %s2514_s24 = scalar_select %p2034_p4, 1, 0 }
  0x1f   : > { %p2042_p6 = por %p2488_p3, %p76_p2  ;;  %p289_p8 = scmp.ne.s32.totalorder %s1868_s10, %s1864_s30 }
  0x20   : > { %p290_p9 = scmp.eq.s32.totalorder %s1309_s21, 7  ;;  %p2049_p10 = por %p284_p7, %p283_p5 }
  0x21   : > { %s2515_s25 = scalar_select %p2042_p6, 1, 0 }
  0x22   : > { %s2516_s26 = scalar_select %p2049_p10, 1, 0 }
  0x23   : > { %p1310_p11 = scmp.ge.s32.totalorder %s1904_s19, 1  ;;  %p2054_p12 = por %p290_p9, %p289_p8 }
  0x24   : > { %2517 = sst [smem:[#allocation25_spill]] %s2516_s26  ;;  %p325_p13 = scmp.lt.s32.totalorder %s1904_s19, 9 }
  0x25   : > { %s2518_s27 = scalar_select %p2054_p12, 1, 0 }
  0x26   : > { %p2059_p0 = pnand %p1310_p11, %p325_p13  ;;  %s1906_s29 = smov [#allocation10]  }
  0x27   : > { %2519 = sst [smem:[#allocation26_spill]] %s2518_s27  ;;  %s355_s12 = sshll.u32 %s1906_s29, 4  ;;  %s356_s12 = int_to_ptr.vmem [resolvable:$true] %s355_s12 }
  0x28   : > { %s2520_s28 = scalar_select %p2059_p0, 1, 0 }
  0x29   : > { %p1460_p1 = pneg %p2059_p0  ;;  %s47_s22 = sadd.s32 1, %s1896_s17 }
  0x2a   : > { %s2522_s6 = sld [smem:[#allocation32_spill]] }
  0x2b   : > { %p2067_p2 = pnand %p1460_p1, %p2488_p3 }
  0x2d   : > { %p1592_p7 = pneg %p2067_p2 }
  0x30   : > { %s1590_s30 = scalar_lea.hbm %s2522_s6, 128 }
  0x31   : > { %p1591_p5 = scmp.ne.s32.totalorder %s2522_s6, %s1590_s30  ;;  %p1597_p11 = scmp.lt.u32.totalorder %s1590_s30, %s2522_s6 }
  0x33   : > { %p1593_p8 = pnand %p1592_p7, %p1591_p5 }
  0x35   : > { %p1594_p9 = pneg %p1593_p8 }
  0x37   : > { %p1599_p13 = pnand %p1597_p11, %p1594_p9 }
  0x39   : > { %1602 = shalt.err (!%p1599_p13)
}
  0x3a   : > { %s1603_s16 = scalar_lea.vmem %s356_s12, 128  ;;  %p1611_p10 = scmp.lt.s32.totalorder %s356_s12, %s356_s12 }
  0x3b   : > { %p1604_p1 = scmp.ne.s32.totalorder %s356_s12, %s1603_s16  ;;  %p1612_p6 = scmp.lt.s32.totalorder %s1603_s16, %s1603_s16 }
  0x3d   : > { %p1606_p3 = pnand %p1604_p1, %p1592_p7  ;;  %p1613_p0 = por %p1612_p6, %p1611_p10 }
  0x3f   : > { %p1607_p12 = pneg %p1606_p3 }
  0x41   : > { %p1614_p4 = pnand %p1613_p0, %p1607_p12 }
  0x43   : > { %1617 = shalt.err (!%p1614_p4)
}
  0x44   : > { %s2492_s8 = smov 64   ;;  %s2494_s9 = smov 4  }
  0x45   : > { %1463 = dma.hbm_to_vmem [thread:$0]  (!%p2067_p2), %s2522_s6, 128, %s356_s12, [#allocation9], %s2492_s8, %s2492_s8, %s2494_s9  }
  0x46   : > { %p48_p3 = scmp.ge.s32.totalorder %s47_s22, 4  ;;  %s54_s23 = sadd.s32 1, %s1900_s18 }
  0x47   : > { %p1485_p4 = scmp.lt.s32.totalorder %s1904_s19, 8  ;;  %s2496_s26 = sand.u32 1, %s1884_s14  }
  0x48   : > { %s2563_s22 = smov (%p48_p3, %s47_s22), 0  ;;  %s2565_s23 = smov (!%p48_p3, %s54_s23), %s1900_s18 }
  0x49   : > { %2523 = sst [smem:[#allocation27_spill]] %s2563_s22  ;;  %s59_s27 = ssub.s32 %s1896_s17, %s2563_s22 }
  0x4a   : > { %s2101_s21 = sshll.u32 %s2496_s26, 3  ;;  %p56_p6 = scmp.ge.s32.totalorder %s2565_s23, 2 }
  0x4b   : > { %s1316_s12 = sshll.u32 %s1896_s17, 1  ;;  %s1317_s29 = sshll.u32 %s1900_s18, 3 }
  0x4c   : > { %p2524_p10 = scmp.ne.s32.totalorder %s2514_s24, 0  ;;  %s2567_s23 = smov (%p56_p6, %s2565_s23), 0 }
  0x4d   : > { %2526 = sst [smem:[#allocation28_spill]] %s2567_s23  ;;  %s382_s16 = sadd.s32 %s1317_s29, %s1316_s12 }
  0x4e   : > { %p2107_p12 = pnand %p1485_p4, %p2524_p10  ;;  %s58_s8 = ssub.s32 %s1900_s18, %s2567_s23 }
  0x4f   : > { %s2115_s9 = sshll.u32 %s382_s16, 6  ;;  %s60_s26 = sor.u32 %s59_s27, %s58_s8 }
  0x50   : > { %p271_p0 = scmp.eq.s32.totalorder %s58_s8, 0  ;;  %p61_p2 = scmp.eq.s32.totalorder %s60_s26, 0 }
  0x51   : > { %s2499_s6 = sand.u32 1, %s1904_s19   ;;  %s2527_s22 = sadd.s32 1, %s1872_s11 }
  0x52   : > { %s2121_s24 = scalar_select %p271_p0, %s1872_s11, %s2527_s22  }
  0x53   : > { %s2528_s17 = sadd.s32 1, %s1884_s14  ;;  %s2529_s1 = sld [smem:[#allocation29_spill]] }
  0x54   : > { %s2126_s7 = scalar_select %p61_p2, %s1884_s14, %s2528_s17  }
  0x55   : > { %s399_s12 = scalar_lea.vmem [#allocation5], %s2101_s21  ;;  %s2139_s8 = scalar_lea.sflag [#allocation6], %s2499_s6 }
  0x56   : > { %s408_s27 = sshll.u32 %s399_s12, 4  ;;  %p2145_p7 = pneg %p2107_p12  ;;  %s2135_s27 = int_to_ptr.vmem [resolvable:$true] %s408_s27 }
  0x59   : > { %s2132_s15 = scalar_lea.hbm %s2529_s1, %s2115_s9  ;;  %s1623_s26 = scalar_lea.hbm %s2529_s1, 1024 }
  0x5a   : > { %s1618_s22 = scalar_lea.hbm %s2132_s15, 128  ;;  %p1624_p11 = scmp.lt.u32.totalorder %s2132_s15, %s2529_s1 }
  0x5b   : > { %p1619_p5 = scmp.ne.s32.totalorder %s2132_s15, %s1618_s22  ;;  %p1625_p13 = scmp.lt.u32.totalorder %s1623_s26, %s1618_s22 }
  0x5c   : > { %p1627_p3 = scmp.lt.u32.totalorder %s1618_s22, %s2132_s15 }
  0x5d   : > { %p1621_p8 = pnand %p2145_p7, %p1619_p5  ;;  %p1626_p1 = por %p1625_p13, %p1624_p11 }
  0x5f   : > { %p1622_p9 = pneg %p1621_p8  ;;  %p1628_p4 = por %p1627_p3, %p1626_p1 }
  0x61   : > { %p1629_p6 = pnand %p1628_p4, %p1622_p9 }
  0x63   : > { %1632 = shalt.err (!%p1629_p6)
}
  0x64   : > { %s1633_s12 = scalar_lea.vmem %s2135_s27, 128  ;;  %s1909_s4 = smov [#allocation5]  }
  0x65   : > { %p1634_p10 = scmp.ne.s32.totalorder %s2135_s27, %s1633_s12  ;;  %s1638_s5 = sshll.u32 %s1909_s4, 4  ;;  %s1639_s5 = int_to_ptr.vmem [resolvable:$false] %s1638_s5 }
  0x66   : > { %s1640_s29 = scalar_lea.vmem %s1639_s5, 256  ;;  %p1641_p5 = scmp.lt.s32.totalorder %s2135_s27, %s1639_s5 }
  0x67   : > { %p1636_p0 = pnand %p1634_p10, %p2145_p7  ;;  %p1642_p8 = scmp.lt.s32.totalorder %s1640_s29, %s1633_s12 }
  0x69   : > { %p1637_p2 = pneg %p1636_p0  ;;  %p1643_p11 = por %p1642_p8, %p1641_p5 }
  0x6b   : > { %p1644_p13 = pnand %p1643_p11, %p1637_p2 }
  0x6d   : > { %1647 = shalt.err (!%p1644_p13)
}
  0x6e   : > { %s2531_s22 = smov 4   ;;  %s2532_s26 = smov 64  }
  0x6f   : > { %1470 = dma.hbm_to_vmem [thread:$0]  (!%p2107_p12), %s2132_s15, 128, %s2135_s27, %s2139_s8, %s2532_s26, %s2532_s26, %s2531_s22  }
  0x70   : > { %s2176_s12 = scalar_lea.hbm %s2472_s0, %s2115_s9  ;;  %s376_s5 = scalar_lea.vmem [#allocation2], %s2101_s21 }
  0x71   : > { %s385_s29 = sshll.u32 %s376_s5, 4  ;;  %s2533_s6 = sand.u32 1, %s1884_s14   ;;  %s2179_s29 = int_to_ptr.vmem [resolvable:$true] %s385_s29 }
  0x72   : > { %s2183_s1 = scalar_lea.sflag [#allocation3], %s2533_s6  ;;  %s1648_s23 = scalar_lea.hbm %s2176_s12, 128 }
  0x73   : > { %p1649_p9 = scmp.ne.s32.totalorder %s2176_s12, %s1648_s23  ;;  %s1653_s16 = scalar_lea.hbm %s2472_s0, 1024 }
  0x74   : > { %p1654_p4 = scmp.lt.u32.totalorder %s2176_s12, %s2472_s0  ;;  %p1655_p6 = scmp.lt.u32.totalorder %s1653_s16, %s1648_s23 }
  0x75   : > { %p1651_p1 = pnand %p1649_p9, %p2145_p7  ;;  %p1657_p0 = scmp.lt.u32.totalorder %s1648_s23, %s2176_s12 }
  0x76   : > { %p1656_p10 = por %p1655_p6, %p1654_p4 }
  0x77   : > { %p1652_p3 = pneg %p1651_p1 }
  0x78   : > { %p1658_p2 = por %p1657_p0, %p1656_p10 }
  0x7a   : > { %p1659_p5 = pnand %p1658_p2, %p1652_p3 }
  0x7c   : > { %1662 = shalt.err (!%p1659_p5)
}
  0x7d   : > { %s1663_s6 = scalar_lea.vmem %s2179_s29, 128  ;;  %s1910_s5 = smov [#allocation2]  }
  0x7e   : > { %p1664_p8 = scmp.ne.s32.totalorder %s2179_s29, %s1663_s6  ;;  %s1668_s15 = sshll.u32 %s1910_s5, 4  ;;  %s1669_s15 = int_to_ptr.vmem [resolvable:$false] %s1668_s15 }
  0x7f   : > { %s1670_s18 = scalar_lea.vmem %s1669_s15, 256  ;;  %p1671_p9 = scmp.lt.s32.totalorder %s2179_s29, %s1669_s15 }
  0x80   : > { %p1666_p11 = pnand %p1664_p8, %p2145_p7  ;;  %p1672_p1 = scmp.lt.s32.totalorder %s1670_s18, %s1663_s6 }
  0x82   : > { %p1667_p13 = pneg %p1666_p11  ;;  %p1673_p4 = por %p1672_p1, %p1671_p9 }
  0x84   : > { %p1674_p6 = pnand %p1673_p4, %p1667_p13 }
  0x86   : > { %1677 = shalt.err (!%p1674_p6)
}
  0x87   : > { %1467 = dma.hbm_to_vmem [thread:$0]  (!%p2107_p12), %s2176_s12, 128, %s2179_s29, %s2183_s1, %s2532_s26, %s2532_s26, %s2531_s22  }
  0x88   : > { %s2214_s16 = scalar_lea.hbm %s2474_s2, %s2115_s9  ;;  %s422_s4 = scalar_lea.vmem [#allocation7], %s2101_s21 }
  0x89   : > { %s433_s6 = sshll.u32 %s422_s4, 4  ;;  %s1678_s5 = scalar_lea.hbm %s2214_s16, 128  ;;  %s2217_s6 = int_to_ptr.vmem [resolvable:$true] %s433_s6 }
  0x8a   : > { %p1679_p3 = scmp.ne.s32.totalorder %s2214_s16, %s1678_s5  ;;  %s1683_s12 = scalar_lea.hbm %s2474_s2, 1024 }
  0x8b   : > { %p1684_p2 = scmp.lt.u32.totalorder %s2214_s16, %s2474_s2  ;;  %p1685_p5 = scmp.lt.u32.totalorder %s1683_s12, %s1678_s5 }
  0x8c   : > { %p1681_p10 = pnand %p1679_p3, %p2145_p7  ;;  %p1687_p11 = scmp.lt.u32.totalorder %s1678_s5, %s2214_s16 }
  0x8d   : > { %p1686_p8 = por %p1685_p5, %p1684_p2 }
  0x8e   : > { %p1682_p0 = pneg %p1681_p10 }
  0x8f   : > { %p1688_p13 = por %p1687_p11, %p1686_p8 }
  0x91   : > { %p1689_p9 = pnand %p1688_p13, %p1682_p0 }
  0x93   : > { %1692 = shalt.err (!%p1689_p9)
}
  0x94   : > { %s1693_s23 = scalar_lea.vmem %s2217_s6, 128  ;;  %s1911_s27 = smov [#allocation7]  }
  0x95   : > { %p1694_p1 = scmp.ne.s32.totalorder %s2217_s6, %s1693_s23  ;;  %s1698_s4 = sshll.u32 %s1911_s27, 4  ;;  %s1699_s4 = int_to_ptr.vmem [resolvable:$false] %s1698_s4 }
  0x96   : > { %s1700_s15 = scalar_lea.vmem %s1699_s4, 256  ;;  %p1701_p3 = scmp.lt.s32.totalorder %s2217_s6, %s1699_s4 }
  0x97   : > { %p1696_p4 = pnand %p1694_p1, %p2145_p7  ;;  %p1702_p10 = scmp.lt.s32.totalorder %s1700_s15, %s1693_s23 }
  0x99   : > { %p1697_p6 = pneg %p1696_p4  ;;  %p1703_p2 = por %p1702_p10, %p1701_p3 }
  0x9b   : > { %p1704_p5 = pnand %p1703_p2, %p1697_p6 }
  0x9d   : > { %1707 = shalt.err (!%p1704_p5)
}
  0x9e   : > { %1473 = dma.hbm_to_vmem [thread:$0]  (!%p2107_p12), %s2214_s16, 128, %s2217_s6, %s2139_s8, %s2532_s26, %s2532_s26, %s2531_s22  }
  0x9f   : > { %s2248_s12 = scalar_lea.hbm %s2475_s3, %s2115_s9  ;;  %s447_s29 = scalar_lea.vmem [#allocation8], %s2101_s21 }
  0xa0   : > { %s458_s18 = sshll.u32 %s447_s29, 4  ;;  %s2534_s23 = sand.u32 1, %s1904_s19   ;;  %s2251_s18 = int_to_ptr.vmem [resolvable:$true] %s458_s18 }
  0xa1   : > { %s2255_s27 = scalar_lea.sflag [#allocation9], %s2534_s23  ;;  %s1708_s4 = scalar_lea.hbm %s2248_s12, 128 }
  0xa2   : > { %p1709_p0 = scmp.ne.s32.totalorder %s2248_s12, %s1708_s4  ;;  %s1713_s9 = scalar_lea.hbm %s2475_s3, 1024 }
  0xa3   : > { %p1714_p13 = scmp.lt.u32.totalorder %s2248_s12, %s2475_s3  ;;  %p1715_p9 = scmp.lt.u32.totalorder %s1713_s9, %s1708_s4 }
  0xa4   : > { %p1711_p8 = pnand %p1709_p0, %p2145_p7  ;;  %p1717_p4 = scmp.lt.u32.totalorder %s1708_s4, %s2248_s12 }
  0xa5   : > { %p1716_p1 = por %p1715_p9, %p1714_p13 }
  0xa6   : > { %p1712_p11 = pneg %p1711_p8 }
  0xa7   : > { %p1718_p6 = por %p1717_p4, %p1716_p1 }
  0xa9   : > { %p1719_p3 = pnand %p1718_p6, %p1712_p11 }
  0xab   : > { %1722 = shalt.err (!%p1719_p3)
}
  0xac   : > { %s1723_s21 = scalar_lea.vmem %s2251_s18, 128  ;;  %s1912_s5 = smov [#allocation8]  }
  0xad   : > { %p1724_p10 = scmp.ne.s32.totalorder %s2251_s18, %s1723_s21  ;;  %s1728_s1 = sshll.u32 %s1912_s5, 4  ;;  %s1729_s1 = int_to_ptr.vmem [resolvable:$false] %s1728_s1 }
  0xae   : > { %s1730_s29 = scalar_lea.vmem %s1729_s1, 256  ;;  %p1731_p0 = scmp.lt.s32.totalorder %s2251_s18, %s1729_s1 }
  0xaf   : > { %p1726_p2 = pnand %p1724_p10, %p2145_p7  ;;  %p1732_p8 = scmp.lt.s32.totalorder %s1730_s29, %s1723_s21 }
  0xb1   : > { %p1727_p5 = pneg %p1726_p2  ;;  %p1733_p13 = por %p1732_p8, %p1731_p0 }
  0xb3   : > { %p1734_p9 = pnand %p1733_p13, %p1727_p5 }
  0xb5   : > { %1737 = shalt.err (!%p1734_p9)
}
  0xb6   : > { %1476 = dma.hbm_to_vmem [thread:$0]  (!%p2107_p12), %s2248_s12, 128, %s2251_s18, %s2255_s27, %s2532_s26, %s2532_s26, %s2531_s22  }
  0xb7   : > { %p2535_p7 = scmp.ne.s32.totalorder %s2520_s28, 0 }
  0xb8   : > { %s472_s17 = sand.u32 (!%p2535_p7), 1, %s1880_s13   ;;  %p2536_p11 = scmp.ne.s32.totalorder (!%p2535_p7), %s2515_s25, 0 }
  0xb9   : > { %470 = sbr.rel (%p2535_p7) target bundleno = 723 (0x2d3), region = 52  ;;  %s2285_s23 = sshll.u32 (!%p2535_p7), %s472_s17, 3 }
  0xba   : > { %s473_s4 = scalar_lea.sflag (!%p2535_p7), [#allocation3], %s472_s17  ;;  %s476_s8 = scalar_lea.vmem (!%p2535_p7), [#allocation2], %s2285_s23 }
  0xc0   : > { %1839 = dma.done.wait (%p2536_p11), %s473_s4, 128  }
  0xc1   : > { %1841 = vsyncadd (%p2536_p11), %s473_s4, 4294967168  ;;  %s481_s30 = sand.u32 1, %s2024_s20   ;;  %s485_s28 = scalar_lea.vmem [#allocation5], %s2285_s23 }
  0xc2   : > { %s482_s22 = scalar_lea.sflag [#allocation6], %s481_s30 }
  0xc3   : > { %1843 = dma.done.wait (%p2536_p11), %s482_s22, 256  }
  0xc4   : > { %1845 = vsyncadd (%p2536_p11), %s482_s22, 4294967040  ;;  %s494_s26 = scalar_lea.vmem [#allocation7], %s2285_s23  ;;  %s500_s12 = scalar_lea.sflag [#allocation9], %s481_s30 }
  0xc5   : > { %s503_s18 = scalar_lea.vmem [#allocation8], %s2285_s23 }
  0xc6   : > { %1847 = dma.done.wait (%p2536_p11), %s500_s12, 128  }
  0xc7   : > { %1849 = vsyncadd (%p2536_p11), %s500_s12, 4294967168  ;;  %p2537_p12 = scmp.eq.s32.totalorder %s2024_s20, 0 }
  0xc9   : > { %1851 = dma.done.wait (%p2537_p12), [#allocation9], 128   ;;  %p2538_p1 = pmov %p2537_p12 }
  0xca   : > { %s2309_s27 = sand.u32 1, %s1868_s10   ;;  %s2539_s15 = sld [smem:[#allocation21_spill]] }
  0xcb   : > { %1853 = vsyncadd (%p2538_p1), [#allocation9], 4294967168  ;;  %s1337_s16 = sshll.u32 %s2309_s27, 4 }
  0xcc   : > { %s2312_s9 = scalar_lea.vmem [#allocation11], %s1337_s16  ;;  %s2314_s6 = scalar_lea.vmem [#allocation12], %s1337_s16 }
  0xd0   : > { %p1339_p4 = scmp.ne.s32.totalorder %s2539_s15, 0 }
  0xd1   : > { %vm593_vm0 = vcmask (!%p1339_p4), 130048   ;;  %v1913_v0 = vmov (!%p1339_p4), 0.0  }
  0xd2   : > { %592 = sbr.rel (%p1339_p4) target bundleno = 217 (0xd9), region = 76  ;;  %594 = vst.msk [vmem:[%s2312_s9] sm:$0xff] (!%p1339_p4), %vm593_vm0, %v1913_v0  ;;  %595 = vst.msk [vmem:[%s2312_s9 + $0x8] sm:$0xff] (!%p1339_p4), %vm593_vm0, %v1913_v0 }
  0xd3   : > { %596 = vst.msk [vmem:[%s2314_s6] sm:$0xff] (!%p1339_p4), %vm593_vm0, %v1913_v0  ;;  %597 = vst.msk [vmem:[%s2314_s6 + $0x8] sm:$0xff] (!%p1339_p4), %vm593_vm0, %v1913_v0 }
  0xd9 PF: > { %v1584_v1 = vld [vmem:[%s476_s8] sm:$0xff]   ;;  %v1914_v2 = vmov 0.0   ;;  %s2540_s21 = sld [smem:[#allocation30_spill]]  ;;  %vm621_vm1 = vcmask 130048   ;;  %s2541_s29 = sld [smem:[#allocation31_spill]]  ;;  %vm1915_vm2 = vmmov 0  }
  0xda   : > { %1388 = vmatprep.subr.bf16.mxu1 %v1914_v2  ;;  %1400 = vmatprep.subr.bf16.mxu0 %v1914_v2  ;;  %v1587_v5 = vld [vmem:[%s485_s28] sm:$0xff]   ;;  %v1588_v6 = vld [vmem:[#allocation10] sm:$0xff]   ;;  %s2542_s8 = sld [smem:[#allocation33_spill]]  ;;  %s2543_s30 = sld [smem:[#allocation22_spill]] }
  0xdb   : > { %1389 = vmatpush3.bf16.msra.mxu1 %v1584_v1  ;;  %1401 = vmatpush3.bf16.msra.mxu0 %v1584_v1  ;;  %v1365_v29 = vld [vmem:[%s494_s26] sm:$0xff]   ;;  %v1369_v30 = vld [vmem:[%s503_s18] sm:$0xff]   ;;  %s1044_s22 = sshll.u32 %s2312_s9, 4  ;;  %s2544_s28 = sld [smem:[#allocation25_spill]]  ;;  %s2364_s22 = int_to_ptr.vmem [resolvable:$true] %s1044_s22 }
  0xdc   : > { %1390 = vmatprep.mubr.msk.bf16.mxu1 %vm1915_vm2, %v1914_v2  ;;  %1402 = vmatprep.mubr.msk.bf16.mxu0 %vm1915_vm2, %v1914_v2  ;;  %v1366_v34 = vunpack.c.l.bf16 %v1365_v29  ;;  %v1370_v35 = vunpack.c.l.bf16 %v1369_v30  ;;  %v1367_v38 = vunpack.c.h.bf16 %v1365_v29  ;;  %v1371_v39 = vunpack.c.h.bf16 %v1369_v30  ;;  %v999_v48 = vld [vmem:[%s2312_s9] sm:$0xff]  ;;  %v1000_v56 = vld [vmem:[%s2312_s9 + $0x8] sm:$0xff]  ;;  %s2545_s18 = sld [smem:[#allocation34_spill]]  ;;  %s1062_s15 = sshll.u32 %s2314_s6, 4  ;;  %s2375_s15 = int_to_ptr.vmem [resolvable:$true] %s1062_s15 }
  0xdd   : > { %1406 = vmatprep.subr.bf16.mxu0 %v1914_v2  ;;  %1394 = vmatprep.subr.bf16.mxu1 %v1914_v2  ;;  %v1011_v49 = vld [vmem:[%s2314_s6] sm:$0xff]  ;;  %v1012_v57 = vld [vmem:[%s2314_s6 + $0x8] sm:$0xff]  ;;  %s2547_s5 = sld [smem:[#allocation35_spill]]  ;;  %s1738_s17 = scalar_lea.vmem %s2364_s22, 256 }
  0xde   : > { %p1739_p6 = scmp.ne.s32.totalorder %s2364_s22, %s1738_s17  ;;  %s1916_s4 = smov [#allocation11]  }
  0xdf   : > { %v1585_v3 = vld [vmem:[%s2540_s21] sm:$0xff]  }
  0xe0   : > { %v1586_v4 = vld [vmem:[%s2541_s29] sm:$0xff]   ;;  %1391 = vmatmul.mubr.msk.bf16.vlgmr.msra.gmra.mrb[0].mxu1 %vm621_vm1, %v1585_v3  ;;  %s1362_s23 = sshll.u32 %s2543_s30, 8  ;;  %s1024_s29 = scalar_lea.sflag [#allocation4], %s2309_s27 }
  0xe1   : > { %1403 = vmatmul.mubr.msk.bf16.vlgmr.msra.gmra.mrb[0].mxu0 %vm621_vm1, %v1586_v4  ;;  %1395 = vmatpush3.bf16.msra.mxu1 %v1587_v5  ;;  %v1589_v18 = vld [vmem:[%s2542_s8] sm:$0xff]   ;;  %p2548_p3 = scmp.ne.s32.totalorder %s2544_s28, 0  ;;  %s1742_s8 = sshll.u32 %s1916_s4, 4  ;;  %s1743_s8 = int_to_ptr.vmem [resolvable:$false] %s1742_s8 }
  0xe2   : > { %1407 = vmatpush3.bf16.msra.mxu0 %v1587_v5  ;;  %1396 = vmatprep.mubr.msk.bf16.mxu1 %vm1915_vm2, %v1914_v2  ;;  %s2546_s20 = smov %s2545_s18  ;;  %s2361_s16 = scalar_lea.hbm %s2545_s18, %s1362_s23 }
  0xe3   : > { %1408 = vmatprep.mubr.msk.bf16.mxu0 %vm1915_vm2, %v1914_v2  ;;  %1424 = vmatprep.subr.bf16.mxu0 %v1914_v2  ;;  %s2373_s1 = scalar_lea.hbm %s2547_s5, %s1362_s23  ;;  %p1740_p10 = pnand %p1739_p6, %p2548_p3 }
  0xe4   : > { %1412 = vmatprep.subr.bf16.mxu1 %v1914_v2  ;;  %s1744_s30 = scalar_lea.vmem %s1743_s8, 512  ;;  %p1745_p5 = scmp.lt.s32.totalorder %s2364_s22, %s1743_s8 }
  0xe5   : > { %p1741_p2 = pneg %p1740_p10  ;;  %p1746_p0 = scmp.lt.s32.totalorder %s1744_s30, %s1738_s17 }
  0xe7   : > { %p1747_p8 = por %p1746_p0, %p1745_p5 }
  0xe8   : > { %1397 = vmatmul.mubr.msk.bf16.vlgmr.msra.gmra.mrb[4].mxu1 %vm621_vm1, %v1586_v4 }
  0xe9   : > { %1414 = vmatprep.mubr.msk.bf16.mxu1 %vm1915_vm2, %v1914_v2  ;;  %1413 = vmatpush3.bf16.msra.mxu1 %v1588_v6  ;;  %p1748_p13 = pnand %p1747_p8, %p1741_p2 }
  0xea   : > { %1418 = vmatprep.subr.bf16.mxu1 %v1914_v2 }
  0xed   : > { %1409 = vmatmul.mubr.msk.bf16.vlgmr.msra.gmra.mrb[0].mxu0 %vm621_vm1, %v1585_v3 }
  0xee   : > { %1426 = vmatprep.mubr.msk.bf16.mxu0 %vm1915_vm2, %v1914_v2  ;;  %1425 = vmatpush3.bf16.msra.mxu0 %v1588_v6 }
  0xef   : > { %1430 = vmatprep.subr.bf16.mxu0 %v1914_v2 }
 0x1b3   : > { %v659_v7 = vpop.f32.mrb[0].mxu1 }
 0x1b4   : > { %v1392_v8 = vpop.f32.mrb[1].mxu1 }
 0x1b5   : > { %v662_v9 = vpop.f32.mrb[2].mxu1 }
 0x1b6   : > { %v1393_v10 = vpop.f32.mrb[3].mxu1 }
 0x1bb   : > { %v714_v11 = vpop.f32.mrb[4].mxu1 }
 0x1bc   : > { %v721_v12 = vsub.f32 %v659_v7, %v714_v11  ;;  %v1398_v13 = vpop.f32.mrb[5].mxu1 }
 0x1bd   : > { %v717_v14 = vpop.f32.mrb[6].mxu1 }
 0x1be   : > { %v722_v15 = vsub.f32 %v662_v9, %v717_v14  ;;  %v1399_v16 = vpop.f32.mrb[7].mxu1 }
 0x1c0   : > { %v798_v17 = vpop.f32.mrb[0].mxu0  ;;  %v805_v19 = vpack.c.bf16 %v722_v15, %v721_v12 }
 0x1c1   : > { %v1410_v20 = vpop.f32.mrb[1].mxu0 }
 0x1c2   : > { %v801_v21 = vpop.f32.mrb[2].mxu0  ;;  %1415 = vmatmul.mubr.msk.bf16.vlgmr.msra.gmra.mrb[8].mxu1 %vm621_vm1, %v805_v19 }
 0x1c3   : > { %v806_v22 = vpack.c.bf16 %v801_v21, %v798_v17  ;;  %v1411_v23 = vpop.f32.mrb[3].mxu0  ;;  %1419 = vmatpush3.bf16.msra.mxu1 %v1589_v18  ;;  %1420 = vmatprep.mubr.msk.bf16.mxu1 %vm1915_vm2, %v1914_v2 }
 0x1c5   : > { %1427 = vmatmul.mubr.msk.bf16.vlgmr.msra.gmra.mrb[4].mxu0 %vm621_vm1, %v806_v22 }
 0x1c6   : > { %1431 = vmatpush3.bf16.msra.mxu0 %v1589_v18  ;;  %1432 = vmatprep.mubr.msk.bf16.mxu0 %vm1915_vm2, %v1914_v2 }
 0x1ca   : > { %1421 = vmatmul.mubr.msk.bf16.vlgmr.msra.gmra.mrb[12].mxu1 %vm621_vm1, %v806_v22 }
 0x1d1   : > { %1433 = vmatmul.mubr.msk.bf16.vlgmr.msra.gmra.mrb[4].mxu0 %vm621_vm1, %v805_v19 }
 0x295   : > { %v850_v24 = vpop.f32.mrb[8].mxu1 }
 0x296   : > { %v1416_v25 = vpop.f32.mrb[9].mxu1 }
 0x297   : > { %v853_v26 = vpop.f32.mrb[10].mxu1 }
 0x298   : > { %v1417_v27 = vpop.f32.mrb[11].mxu1 }
 0x29d   : > { %v900_v28 = vpop.f32.mrb[12].mxu1 }
 0x29e   : > { %v907_v31 = vsub.f32 %v850_v24, %v900_v28  ;;  %v1422_v32 = vpop.f32.mrb[13].mxu1 }
 0x29f   : > { %v903_v33 = vpop.f32.mrb[14].mxu1 }
 0x2a0   : > { %v908_v36 = vsub.f32 %v853_v26, %v903_v33  ;;  %v1423_v37 = vpop.f32.mrb[15].mxu1  ;;  %v1001_v41 = vmul.f32 %v1366_v34, %v907_v31  ;;  %v1015_v42 = vmul.f32 %v1370_v35, %v907_v31 }
 0x2a2   : > { %v1002_v46 = vmul.f32 %v1367_v38, %v908_v36  ;;  %v1016_v47 = vmul.f32 %v1371_v39, %v908_v36 }
 0x2a4   : > { %v984_v40 = vpop.f32.mrb[4].mxu0 }
 0x2a5   : > { %v1003_v43 = vmul.f32 %v1370_v35, %v984_v40  ;;  %v1013_v44 = vmul.f32 %v1366_v34, %v984_v40  ;;  %v1434_v45 = vpop.f32.mrb[5].mxu0 }
 0x2a6   : > { %v987_v50 = vpop.f32.mrb[6].mxu0 }
 0x2a7   : > { %v1005_v51 = vadd.f32 %v1003_v43, %v1001_v41  ;;  %v1017_v52 = vsub.f32 %v1013_v44, %v1015_v42  ;;  %v1004_v53 = vmul.f32 %v1371_v39, %v987_v50  ;;  %v1014_v54 = vmul.f32 %v1367_v38, %v987_v50  ;;  %v1435_v55 = vpop.f32.mrb[7].mxu0 }
 0x2a9   : > { %v1007_v58 = vadd.f32 %v1005_v51, %v999_v48  ;;  %v1019_v59 = vadd.f32 %v1017_v52, %v1011_v49  ;;  %v1006_v60 = vadd.f32 %v1004_v53, %v1002_v46  ;;  %v1018_v61 = vsub.f32 %v1014_v54, %v1016_v47 }
 0x2ab   : > { %1009 = vst.msk [vmem:[%s2312_s9] sm:$0xff] %vm621_vm1, %v1007_v58  ;;  %1021 = vst.msk [vmem:[%s2314_s6] sm:$0xff] %vm621_vm1, %v1019_v59  ;;  %v1008_v62 = vadd.f32 %v1006_v60, %v1000_v56  ;;  %v1020_v63 = vadd.f32 %v1018_v61, %v1012_v57 }
 0x2ad   : > { %1010 = vst.msk [vmem:[%s2312_s9 + $0x8] sm:$0xff] %vm621_vm1, %v1008_v62  ;;  %1022 = vst.msk [vmem:[%s2314_s6 + $0x8] sm:$0xff] %vm621_vm1, %v1020_v63 }
 0x2ae   : > { %1751 = shalt.err (!%p1748_p13)
}
 0x2af   : > { %s1752_s9 = scalar_lea.hbm %s2361_s16, 256  ;;  %s1756_s26 = scalar_lea.hbm %s2546_s20, 512 }
 0x2b0   : > { %p1753_p9 = scmp.ne.s32.totalorder %s2361_s16, %s1752_s9  ;;  %p1757_p12 = scmp.lt.u32.totalorder %s2361_s16, %s2546_s20 }
 0x2b1   : > { %p1758_p1 = scmp.lt.u32.totalorder %s1756_s26, %s1752_s9  ;;  %p1760_p6 = scmp.lt.u32.totalorder %s1752_s9, %s2361_s16 }
 0x2b2   : > { %p1754_p7 = pnand %p1753_p9, %p2548_p3 }
 0x2b3   : > { %p1759_p4 = por %p1758_p1, %p1757_p12 }
 0x2b4   : > { %p1755_p11 = pneg %p1754_p7 }
 0x2b5   : > { %p1761_p10 = por %p1760_p6, %p1759_p4 }
 0x2b7   : > { %p1762_p2 = pnand %p1761_p10, %p1755_p11 }
 0x2b9   : > { %1765 = shalt.err (!%p1762_p2)
}
 0x2ba   : > { %s1917_s25 = smov 128   ;;  %s1918_s21 = smov 8  }
 0x2bb   : > { %1456 = dma.vmem_to_hbm [thread:$0]  (%p2548_p3), %s2364_s22, 256, %s2361_s16, %s1024_s29, %s1917_s25, %s1917_s25, %s1918_s21  }
 0x2bc   : > { %s1029_s17 = scalar_lea.sflag [#allocation13], %s2309_s27  ;;  %s1766_s4 = scalar_lea.vmem %s2375_s15, 256 }
 0x2bd   : > { %p1767_p5 = scmp.ne.s32.totalorder %s2375_s15, %s1766_s4  ;;  %s1919_s8 = smov [#allocation12]  }
 0x2be   : > { %s1770_s30 = sshll.u32 %s1919_s8, 4  ;;  %s1771_s30 = int_to_ptr.vmem [resolvable:$false] %s1770_s30 }
 0x2bf   : > { %p1768_p0 = pnand %p1767_p5, %p2548_p3  ;;  %s1772_s9 = scalar_lea.vmem %s1771_s30, 512 }
 0x2c0   : > { %p1773_p13 = scmp.lt.s32.totalorder %s2375_s15, %s1771_s30  ;;  %p1774_p9 = scmp.lt.s32.totalorder %s1772_s9, %s1766_s4 }
 0x2c1   : > { %p1769_p8 = pneg %p1768_p0 }
 0x2c2   : > { %p1775_p7 = por %p1774_p9, %p1773_p13 }
 0x2c4   : > { %p1776_p11 = pnand %p1775_p7, %p1769_p8 }
 0x2c6   : > { %1779 = shalt.err (!%p1776_p11)
}
 0x2c7   : > { %s1780_s22 = scalar_lea.hbm %s2373_s1, 256  ;;  %s1784_s6 = scalar_lea.hbm %s2547_s5, 512 }
 0x2c8   : > { %p1781_p12 = scmp.ne.s32.totalorder %s2373_s1, %s1780_s22  ;;  %p1785_p6 = scmp.lt.u32.totalorder %s2373_s1, %s2547_s5 }
 0x2c9   : > { %p1786_p10 = scmp.lt.u32.totalorder %s1784_s6, %s1780_s22  ;;  %p1788_p5 = scmp.lt.u32.totalorder %s1780_s22, %s2373_s1 }
 0x2ca   : > { %p1782_p1 = pnand %p1781_p12, %p2548_p3 }
 0x2cb   : > { %p1787_p2 = por %p1786_p10, %p1785_p6 }
 0x2cc   : > { %p1783_p4 = pneg %p1782_p1 }
 0x2cd   : > { %p1789_p0 = por %p1788_p5, %p1787_p2 }
 0x2cf   : > { %p1790_p8 = pnand %p1789_p0, %p1783_p4 }
 0x2d1   : > { %1793 = shalt.err (!%p1790_p8)
}
 0x2d2   : > { %1457 = dma.vmem_to_hbm [thread:$0]  (%p2548_p3), %s2375_s15, 256, %s2373_s1, %s1029_s17, %s1917_s25, %s1917_s25, %s1918_s21  }
 0x2d3 PF: > { %s2549_s12 = sld [smem:[#allocation20_spill]]  ;;  %s2550_s18 = sld [smem:[#allocation26_spill]] }
 0x2d4   : > { %p1487_p13 = scmp.ge.s32.totalorder %s1904_s19, 2 }
 0x2d9   : > { %s1077_s4 = sand.u32 1, %s2549_s12   ;;  %p2551_p9 = scmp.ne.s32.totalorder %s2550_s18, 0 }
 0x2da   : > { %s1078_s8 = scalar_lea.sflag [#allocation4], %s1077_s4 }
 0x2db   : > { %p1478_p7 = pnand %p1487_p13, %p2551_p9 }
 0x2dd   : > { %1855 = dma.done.wait (!%p1478_p7), %s1078_s8, 256  }
 0x2de   : > { %1857 = vsyncadd (!%p1478_p7), %s1078_s8, 4294967040  ;;  %s1087_s28 = scalar_lea.sflag [#allocation13], %s1077_s4 }
 0x2df   : > { %1859 = dma.done.wait (!%p1478_p7), %s1087_s28, 256  }
 0x2e0   : > { %1861 = vsyncadd (!%p1478_p7), %s1087_s28, 4294967040  ;;  %s35_s19 = sadd.s32 1, %s1904_s19   ;;  %s2552_s15 = sld [smem:[#allocation23_spill]] }
 0x2e1   : > { %p32_p11 = scmp.ge.s32.totalorder %s35_s19, 10   ;;  %s2553_s16 = sld [smem:[#allocation24_spill]] }
 0x2e2   : > { %s2554_s17 = sld [smem:[#allocation27_spill]]  ;;  %s2555_s18 = sld [smem:[#allocation28_spill]] }
 0x2e3   : > { %s2556_s30 = smov %s1868_s10  ;;  %s2557_s10 = smov %s1872_s11 }
 0x2e4   : > { %s2558_s11 = smov %s2121_s24  ;;  %s2559_s12 = smov %s1880_s13 }
 0x2e5   : > { %s2560_s13 = smov %s1884_s14  ;;  %s2561_s14 = smov %s2126_s7 }
 0x2e6   :  { %34 = sbr.rel (!%p32_p11) target bundleno = 23 (0x17), region = 165 }
 0x2ed   :  { %1092 = vsyncpa [#allocation3], 1 }
 0x2ee   :  { %1094 = vsyncpa [#allocation3 + $0x1], 1 }
 0x2ef   :  { %1095 = vsyncpa [#allocation6], 1 }
 0x2f0   :  { %1097 = vsyncpa [#allocation6 + $0x1], 1 }
 0x2f1   :  { %1098 = vsyncpa [#allocation9], 1 }
 0x2f2   :  { %1100 = vsyncpa [#allocation9 + $0x1], 1 }
 0x2f3   :  { %1101 = vsyncpa [#allocation4], 1 }
 0x2f4   :  { %1103 = vsyncpa [#allocation4 + $0x1], 1 }
 0x2f5   :  { %1104 = vsyncpa [#allocation13], 1 }
 0x2f6   :  { %1106 = vsyncpa [#allocation13 + $0x1], 1 }

</bundles_post_ra>
